<compile_context>
chip_gen: v5e
topology: v5e:2x2
jax: 0.10.0
libtpu: 0.0.40
codegen_flags: <defaults>
</compile_context>

<pallas_src>
import jax
import jax.numpy as jnp
from jax.experimental import pallas as pl
from jax.experimental.pallas import tpu as pltpu


def _round_up(n, m):
    return (n + m - 1) // m * m


def _fused_heads_kernel(x_ref, w_ref, b_ref, out_ref):
    # x_ref:   (TB, C_in)    streamed row tile (compute dtype, e.g. bf16)
    # w_ref:   (C_in, Fpad)  pre-transposed fused [W_mu | W_lv], whole-array VMEM resident
    # b_ref:   (1, Fpad)     fused [b_mu | b_lv] in f32, whole-array VMEM resident
    # out_ref: (TB, Fpad)    lane-dense fused output (mu | logvar | zero-pad)
    acc = jnp.dot(x_ref[...], w_ref[...], preferred_element_type=jnp.float32)
    # f32 accumulate + f32 bias add, single cast at the store (v5e-friendly epilogue).
    out_ref[...] = (acc + b_ref[...]).astype(out_ref.dtype)


def prepare_threshold_net_params(w_mu, b_mu, w_lv, b_lv, *, compute_dtype=jnp.bfloat16):
    """One-time parameter prep (hoisted out of the per-call hot path).

    Fuses the two linear heads, zero-pads the fused output dim to a multiple of
    128 lanes (unmasked lane-dense stores), transposes to the canonical (K, N)
    MXU layout and casts to the compute dtype.

    Returns (w_fused_t (C_in, Fpad) compute_dtype, b_fused (1, Fpad) f32, c_out).
    """
    c_out, _ = w_mu.shape
    f = 2 * c_out
    f_pad = _round_up(f, 128)
    w = jnp.concatenate([w_mu, w_lv], axis=0)            # (2*C_out, C_in), PyTorch (out, in)
    b = jnp.concatenate([b_mu, b_lv], axis=0)            # (2*C_out,)
    if f_pad != f:
        w = jnp.pad(w, ((0, f_pad - f), (0, 0)))
        b = jnp.pad(b, (0, f_pad - f))
    w_t = jnp.transpose(w).astype(compute_dtype)          # (C_in, Fpad): canonical (K, N)
    b2 = b.astype(jnp.float32).reshape(1, f_pad)           # bias stays f32 for the epilogue
    return w_t, b2, c_out


def threshold_net_forward(x, w_fused_t, b_fused, c_out, *, row_tile=512):
    """x: (..., C_in). Returns (mu, logvar), each (..., C_out) in x.dtype."""
    lead_shape = x.shape[:-1]
    c_in = x.shape[-1]
    f_pad = w_fused_t.shape[1]
    out_dtype = x.dtype

    # Flatten all leading dims into one row axis; cast to the compute dtype
    # (halves the activation DMA too).  No row padding: Pallas masks the ragged
    # edge block's output stores, and those rows are never read back anyway.
    x2 = x.reshape(-1, c_in).astype(w_fused_t.dtype)
    n = x2.shape[0]

    # Row tile: multiple of 8 (sublane).  Split into >= 2 grid steps whenever
    # possible so the "parallel" axis actually engages both v7x TensorCores.
    tb = min(row_tile, max(8, _round_up(pl.cdiv(n, 2), 8)))
    grid = (pl.cdiv(n, tb),)

    x_bytes = jnp.dtype(x2.dtype).itemsize
    w_bytes = jnp.dtype(w_fused_t.dtype).itemsize
    o_bytes = jnp.dtype(out_dtype).itemsize
    cost = pl.CostEstimate(
        flops=2 * n * c_in * (2 * c_out),                 # unpadded counts
        transcendentals=0,
        bytes_accessed=(n * c_in * x_bytes                # activation read
                        + c_in * f_pad * w_bytes          # fused weight read
                        + f_pad * 4                       # f32 bias read
                        + n * f_pad * o_bytes),           # output write
    )

    out = pl.pallas_call(
        _fused_heads_kernel,
        out_shape=jax.ShapeDtypeStruct((n, f_pad), out_dtype),
        grid=grid,
        in_specs=[
            pl.BlockSpec((tb, c_in), lambda i: (i, 0)),                  # streamed rows
            pl.BlockSpec(memory_space=pltpu.MemorySpace.VMEM),           # resident fused weight (single copy)
            pl.BlockSpec(memory_space=pltpu.MemorySpace.VMEM),           # resident fused bias   (single copy)
        ],
        out_specs=pl.BlockSpec((tb, f_pad), lambda i: (i, 0)),
        compiler_params=pltpu.CompilerParams(
            dimension_semantics=("parallel",),
        ),
        cost_estimate=cost,
    )(x2, w_fused_t, b_fused)

    mu = out[:, :c_out].reshape(lead_shape + (c_out,))
    logvar = out[:, c_out:2 * c_out].reshape(lead_shape + (c_out,))
    return mu, logvar


if __name__ == "__main__":
    # Small shapes consistent with the module: ThresholdNet input in ResNetMultiBayes
    # is the AdaptiveAvgPool2d((19,1)) feature squeezed/permuted to (B, 19, C_in).
    # Full model uses C_in=2048, C_out=256; here a scaled-down B=2, S=19, C_in=128,
    # C_out=48 (exercises lane-padding, the ragged-edge row block and the 2-step grid).
    B, S, C_in, C_out = 2, 19, 128, 48
    key = jax.random.PRNGKey(0)
    kx, kw1, kb1, kw2, kb2 = jax.random.split(key, 5)

    x = jax.random.normal(kx, (B, S, C_in), dtype=jnp.float32)
    # PyTorch nn.Linear parameter shapes: weight (out, in), bias (out,)
    w_mu = jax.random.normal(kw1, (C_out, C_in), dtype=jnp.float32) * 0.1
    b_mu = jax.random.normal(kb1, (C_out,), dtype=jnp.float32) * 0.1
    w_lv = jax.random.normal(kw2, (C_out, C_in), dtype=jnp.float32) * 0.1
    b_lv = jax.random.normal(kb2, (C_out,), dtype=jnp.float32) * 0.1

    # One-time fused-parameter prep (hoisted out of the forward). bf16 compute.
    w_fused_t, b_fused, c_out = prepare_threshold_net_params(
        w_mu, b_mu, w_lv, b_lv, compute_dtype=jnp.bfloat16)

    mu, logvar = threshold_net_forward(x, w_fused_t, b_fused, c_out)
    jax.block_until_ready((mu, logvar))

    # Correctness check against a plain-JAX reference of the PyTorch forward,
    # with the bf16 operand rounding emulated (accumulation is f32 in both).
    xb = x.astype(jnp.bfloat16).astype(jnp.float32)
    wmb = w_mu.astype(jnp.bfloat16).astype(jnp.float32)
    wlb = w_lv.astype(jnp.bfloat16).astype(jnp.float32)
    mu_ref = jnp.einsum("bsc,oc->bso", xb, wmb) + b_mu
    lv_ref = jnp.einsum("bsc,oc->bso", xb, wlb) + b_lv

    assert mu.shape == (B, S, C_out) and logvar.shape == (B, S, C_out)
    assert jnp.allclose(mu, mu_ref, atol=1e-2, rtol=1e-2), "mu mismatch"
    assert jnp.allclose(logvar, lv_ref, atol=1e-2, rtol=1e-2), "logvar mismatch"

    print("KERNEL_OK")
</pallas_src>

<mosaic_0001>
module attributes {stable_mosaic.version = 11 : i64} {
  func.func @_fused_heads_kernel(%arg0: i32, %arg1: memref<24x128xbf16, #tpu.memory_space<vmem>>, %arg2: memref<128x128xbf16, #tpu.memory_space<vmem>>, %arg3: memref<1x128xf32, #tpu.memory_space<vmem>>, %arg4: memref<24x128xf32, #tpu.memory_space<vmem>>) attributes {dimension_semantics = [#tpu.dimension_semantics<parallel>], iteration_bounds = array<i64: 2>, scalar_prefetch = 0 : i64, scratch_operands = 0 : i64, tpu.core_type = #tpu.core_type<tc>, window_params = [{transform_indices = @transform_0, window_bounds = array<i64: 24, 128>}, {pipeline_mode = #tpu.pipeline_mode<synchronous>, transform_indices = @transform_1, window_bounds = array<i64: 128, 128>}, {pipeline_mode = #tpu.pipeline_mode<synchronous>, transform_indices = @transform_2, window_bounds = array<i64: 1, 128>}, {transform_indices = @transform_3, window_bounds = array<i64: 24, 128>}]} {
    %c0 = arith.constant 0 : index
    %c0_0 = arith.constant 0 : index
    %0 = vector.load %arg1[%c0, %c0_0] : memref<24x128xbf16, #tpu.memory_space<vmem>>, vector<24x128xbf16>
    %c0_1 = arith.constant 0 : index
    %c0_2 = arith.constant 0 : index
    %1 = vector.load %arg2[%c0_1, %c0_2] : memref<128x128xbf16, #tpu.memory_space<vmem>>, vector<128x128xbf16>
    %cst = arith.constant dense<0.000000e+00> : vector<24x128xf32>
    %2 = tpu.matmul %0, %1, %cst {dimension_numbers = #tpu.dot_dimension_numbers<[1], [0], [0], [1], [0, 0, 1, 1], [], []>} : vector<24x128xbf16>, vector<128x128xbf16>, vector<24x128xf32> -> vector<24x128xf32>
    %c0_3 = arith.constant 0 : index
    %c0_4 = arith.constant 0 : index
    %3 = vector.load %arg3[%c0_3, %c0_4] : memref<1x128xf32, #tpu.memory_space<vmem>>, vector<1x128xf32>
    %4 = vector.broadcast %3 : vector<1x128xf32> to vector<24x128xf32>
    %5 = arith.addf %2, %4 : vector<24x128xf32>
    %c0_5 = arith.constant 0 : index
    %c0_6 = arith.constant 0 : index
    %6 = vector.load %arg4[%c0_5, %c0_6] : memref<24x128xf32, #tpu.memory_space<vmem>>, vector<24x128xf32>
    tpu.vector_store %arg4[%c0_5, %c0_6], %5 {strides = array<i32>} : memref<24x128xf32, #tpu.memory_space<vmem>>, vector<24x128xf32>,
    return
  }
  func.func @transform_0(%arg0: i32) -> (i32, i32) {
    %c0_i32 = arith.constant 0 : i32
    %c0_i32_0 = arith.constant 0 : i32
    return %arg0, %c0_i32 : i32, i32
  }
  func.func @transform_1(%arg0: i32) -> (i32, i32) {
    %c0_i32 = arith.constant 0 : i32
    %c0_i32_0 = arith.constant 0 : i32
    %c0_i32_1 = arith.constant 0 : i32
    return %c0_i32, %c0_i32_0 : i32, i32
  }
  func.func @transform_2(%arg0: i32) -> (i32, i32) {
    %c0_i32 = arith.constant 0 : i32
    %c0_i32_0 = arith.constant 0 : i32
    %c0_i32_1 = arith.constant 0 : i32
    return %c0_i32, %c0_i32_0 : i32, i32
  }
  func.func @transform_3(%arg0: i32) -> (i32, i32) {
    %c0_i32 = arith.constant 0 : i32
    %c0_i32_0 = arith.constant 0 : i32
    return %arg0, %c0_i32 : i32, i32
  }
}

</mosaic_0001>

<bundles_post_ra>
// kernel: tpu_custom_call.1
= control target key start
LH: loop header
LB: loop body
LE: loop exit
PB: predicated region body
PF: predicated region fallthrough
CT: control target
= control target key end

     0   :  { %8 = vsyncpa [#allocation3], 0  ;;  %s949_s0 = inlined_call_operand.hbm [shape: bf16[38,128], index: 0, kind: input, shape index: {}]   ;;  %s950_s1 = inlined_call_operand.hbm [shape: bf16[128,128], index: 1, kind: input, shape index: {}]   ;;  %s951_s2 = inlined_call_operand.vmem [shape: f32[1,128], index: 2, kind: input, shape index: {}]   ;;  %s952_s3 = inlined_call_operand.hbm [shape: f32[38,128], index: 3, kind: output, shape index: {}]  }
   0x1   :  { %10 = vsyncpa [#allocation3 + $0x1], 0 }
   0x2   :  { %11 = vsyncpa [#allocation6], 0 }
   0x3   :  { %12 = vsyncpa [#allocation4], 0 }
   0x4   :  { %14 = vsyncpa [#allocation4 + $0x1], 0  ;;  %s747_s12 = smov 0   ;;  %s749_s13 = smov 0  }
   0x5   :  { %s751_s14 = smov 0   ;;  %s753_s15 = smov 0  }
   0x6 LB: > { %s768_s16 = sadd.s32 4294967295, %s716_s15   ;;  %s433_s17 = sadd.s32 4294967294, %s716_s15   ;;  %s716_s15 = sphi %s753_s15, %s969_s15   ;;  %s712_s14 = sphi %s751_s14, %s968_s14   ;;  %s708_s13 = sphi %s749_s13, %s967_s13   ;;  %s704_s12 = sphi %s747_s12, %s966_s12  }
   0x7   : > { %s772_s18 = sadd.s32 1, %s716_s15   ;;  %s27_s19 = sadd.s32 1, %s712_s14 }
   0x8   : > { %s24_s20 = ssub.s32 %s716_s15, %s772_s18  ;;  %p34_p0 = scmp.ne.s32.totalorder %s712_s14, %s708_s13 }
   0x9   : > { %p25_p1 = scmp.eq.s32.totalorder %s24_s20, 0  ;;  %p35_p2 = scmp.eq.s32.totalorder %s716_s15, 0 }
   0xa   : > { %p40_p3 = scmp.ne.s32.totalorder %s708_s13, %s704_s12  ;;  %p954_p4 = scmp.eq.s32.totalorder %s768_s16, 0 }
   0xb   : > { %s784_s21 = scalar_select %p25_p1, %s712_s14, %s27_s19  }
   0xc   : > { %p786_p5 = por %p35_p2, %p34_p0  ;;  %p792_p6 = por %p954_p4, %p40_p3 }
   0xd   : > { %p106_p7 = scmp.eq.s32.totalorder %s768_s16, 1  ;;  %p112_p8 = scmp.eq.s32.totalorder %s433_s17, 1 }
   0xe   : > { %p434_p9 = scmp.ge.s32.totalorder %s716_s15, 1  ;;  %p119_p10 = scmp.lt.s32.totalorder %s716_s15, 3 }
   0xf   : > { %p799_p11 = por %p106_p7, %p34_p0  ;;  %p803_p12 = por %p112_p8, %p40_p3 }
  0x10   : > { %p807_p13 = pnand %p434_p9, %p119_p10  ;;  %s130_s29 = sshll.u32 %s950_s1, 4  ;;  %s131_s29 = int_to_ptr.hbm [resolvable:$true] %s130_s29 }
  0x11   : > { %s958_s25 = scalar_select %p803_p12, 1, 0 }
  0x12   : > { %p515_p1 = pneg %p807_p13  ;;  %s718_s30 = smov [#allocation5]  }
  0x13   : > { %s132_s4 = sshll.u32 %s718_s30, 4  ;;  %s719_s5 = smov 64   ;;  %s133_s4 = int_to_ptr.vmem [resolvable:$true] %s132_s4 }
  0x14   : > { %p516_p0 = pnand %p515_p1, %p954_p4  ;;  %s720_s6 = smov 4  }
  0x15   : > { %p953_p2 = scmp.ge.s32.totalorder %s716_s15, 2 }
  0x16   : > { %518 = dma.hbm_to_vmem [thread:$0]  (!%p516_p0), %s131_s29, 1024, %s133_s4, [#allocation6], %s719_s5, %s719_s5, %s720_s6  }
  0x17   : > { %145 = sbr.rel (%p953_p2) target bundleno = 66 (0x42), region = 24 }
  0x1c   : > { %148 = sbr.rel (!%p786_p5) target bundleno = 66 (0x42), region = 28  ;;  %s149_s7 = sand.u32 (%p786_p5), 1, %s712_s14  }
  0x1d   : > { %s154_s8 = smul.u32 (%p786_p5), 3, %s716_s15  ;;  %s828_s20 = scalar_lea.sflag (%p786_p5), [#allocation3], %s149_s7 }
  0x1e   : > { %s506_s9 = smul.u32 (%p786_p5), 12, %s149_s7 }
  0x1f   : > { %s155_s10 = ssub.s32 (%p786_p5), 5, %s154_s8 }
  0x20   : > { %p156_p3 = scmp.lt.s32.totalorder (%p786_p5), %s155_s10, 3  ;;  %s153_s27 = scalar_lea.vmem (%p786_p5), [#allocation2], %s506_s9 }
  0x22   : > { %s971_s10 = smov (!%p156_p3, %s155_s10), 3 }
  0x23   : > { %s437_s11 = sshll.u32 %s971_s10, 2 }
  0x24   : > { %s159_s17 = ssub.s32 12, %s437_s11 }
  0x25   : > { %s160_s19 = sshll.u32 %s159_s17, 4 }
  0x26   : > { %161 = vsyncadd %s828_s20, %s160_s19  ;;  %p831_p5 = scmp.ne.s32.totalorder %s437_s11, 0  ;;  %s487_s28 = smul.u32 12, %s716_s15 }
  0x27   : > { %s836_s29 = sshll.u32 %s153_s27, 4  ;;  %s441_s30 = sshll.u32 %s971_s10, 6  ;;  %s169_s29 = int_to_ptr.vmem [resolvable:$true] %s836_s29 }
  0x28   : > { %s164_s6 = scalar_lea.hbm %s949_s0, %s487_s28  ;;  %s598_s9 = sshrl.u32 %s441_s30, 4 }
  0x29   : > { %s166_s7 = sshll.u32 %s164_s6, 4  ;;  %s607_s27 = scalar_lea.hbm %s949_s0, 20  ;;  %s843_s7 = int_to_ptr.hbm [resolvable:$true] %s166_s7 }
  0x2a   : > { %s596_s8 = sshra.s32 %s843_s7, 4  ;;  %s597_s8 = int_to_ptr.hbm [resolvable:$true] %s596_s8 }
  0x2b   : > { %s603_s11 = scalar_lea.hbm %s597_s8, %s598_s9  ;;  %p608_p10 = scmp.lt.s32.totalorder %s597_s8, %s949_s0 }
  0x2c   : > { %p604_p7 = scmp.ne.s32.totalorder %s597_s8, %s603_s11  ;;  %p609_p1 = scmp.lt.s32.totalorder %s607_s27, %s603_s11 }
  0x2e   : > { %p605_p8 = pnand %p604_p7, %p831_p5  ;;  %p610_p0 = por %p609_p1, %p608_p10 }
  0x30   : > { %p606_p9 = pneg %p605_p8 }
  0x32   : > { %p611_p3 = pnand %p610_p0, %p606_p9 }
  0x34   : > { %614 = shalt.err (!%p611_p3)
}
  0x35   : > { %s615_s5 = sshra.s32 %s169_s29, 4  ;;  %s721_s17 = smov [#allocation2]   ;;  %s616_s5 = int_to_ptr.vmem [resolvable:$true] %s615_s5 }
  0x36   : > { %s622_s6 = scalar_lea.vmem %s616_s5, %s598_s9  ;;  %s626_s19 = scalar_lea.vmem %s721_s17, 24 }
  0x37   : > { %p623_p7 = scmp.ne.s32.totalorder %s616_s5, %s622_s6  ;;  %p628_p4 = scmp.lt.s32.totalorder %s626_s19, %s622_s6 }
  0x39   : > { %p624_p8 = pnand %p623_p7, %p831_p5 }
  0x3b   : > { %p625_p2 = pneg %p624_p8 }
  0x3d   : > { %p630_p12 = pnand %p628_p4, %p625_p2 }
  0x3f   : > { %633 = shalt.err (!%p630_p12)
}
  0x40   : > { %s722_s8 = smov 64   ;;  %s723_s11 = smov 4  }
  0x41   : > { %174 = dma.hbm_to_vmem [thread:$0]  (%p831_p5), %s843_s7, %s441_s30, %s169_s29, %s828_s20, %s722_s8, %s722_s8, %s723_s11  }
  0x42 PF: > { %180 = sbr.rel (%p807_p13) target bundleno = 275 (0x113), region = 32  ;;  %s871_s9 = sand.u32 (!%p807_p13), 1, %s708_s13  }
  0x43   : > { %s507_s27 = smul.u32 (!%p807_p13), 12, %s871_s9  ;;  %s183_s4 = scalar_lea.sflag (!%p807_p13), [#allocation3], %s871_s9 }
  0x45   : > { %s186_s28 = scalar_lea.vmem (!%p807_p13), [#allocation2], %s507_s27 }
  0x47   : > { %691 = dma.done.wait (%p792_p6), %s183_s4, 192  }
  0x48   : > { %693 = vsyncadd (%p792_p6), %s183_s4, 4294967104  ;;  %p961_p4 = scmp.eq.s32.totalorder %s768_s16, 0 }
  0x4a   : > { %695 = dma.done.wait (%p961_p4), [#allocation6], 1024   ;;  %p962_p12 = pmov %p961_p4 }
  0x4b   : > { %v496_v0 = vld [vmem:[#allocation5 + $0x38] sm:$0xff]  ;;  %v495_v1 = vld [vmem:[#allocation5 + $0x30] sm:$0xff]  ;;  %v494_v2 = vld [vmem:[#allocation5 + $0x28] sm:$0xff]  ;;  %s508_s23 = smul.u32 24, %s871_s9  ;;  %s328_s22 = scalar_lea.sflag [#allocation4], %s871_s9 }
  0x4c   : > { %697 = vsyncadd (%p962_p12), [#allocation6], 4294966272  ;;  %306 = vmatpush.bf16.msra.mxu0 %v496_v0  ;;  %498 = vmatpush.bf16.msra.mxu1 %v496_v0  ;;  %v493_v3 = vld [vmem:[#allocation5 + $0x20] sm:$0xff]  ;;  %v492_v4 = vld [vmem:[#allocation5 + $0x18] sm:$0xff]  ;;  %s335_s29 = smul.u32 (%p799_p11), 3, %s768_s16 }
  0x4d   : > { %v491_v5 = vld [vmem:[#allocation5 + $0x10] sm:$0xff]  ;;  %v490_v6 = vld [vmem:[#allocation5 + $0x8] sm:$0xff]  ;;  %v489_v9 = vld [vmem:[#allocation5] sm:$0xff]  ;;  %s214_s20 = scalar_lea.vmem [#allocation7], %s508_s23 }
  0x4e   : > { %v227_v7 = vld [vmem:[%s186_s28 + $0x8] sm:$0xf]  ;;  %v488_v10 = vld [vmem:[%s186_s28] sm:$0xff]  ;;  %s336_s30 = ssub.s32 (%p799_p11), 5, %s335_s29 }
  0x4f   : > { %v253_v8 = vunpack.c.l.b16 %v227_v7  ;;  %v565_v12 = vld [vmem:[%s951_s2] ss:$0 sm:$0xff]  ;;  %p337_p6 = scmp.lt.s32.totalorder (%p799_p11), %s336_s30, 3 }
  0x50   : > { %307 = vmatpush.bf16.msra.mxu0 %v495_v1  ;;  %499 = vmatpush.bf16.msra.mxu1 %v495_v1 }
  0x51   : > { %v255_v11 = vpack.c.b16 %v253_v8, %v253_v8 }
  0x54   : > { %308 = vmatpush.bf16.msra.mxu0 %v494_v2  ;;  %500 = vmatpush.bf16.msra.mxu1 %v494_v2 }
  0x58   : > { %309 = vmatpush.bf16.msra.mxu0 %v493_v3  ;;  %501 = vmatpush.bf16.msra.mxu1 %v493_v3 }
  0x5c   : > { %310 = vmatpush.bf16.msra.mxu0 %v492_v4  ;;  %502 = vmatpush.bf16.msra.mxu1 %v492_v4 }
  0x60   : > { %311 = vmatpush.bf16.msra.mxu0 %v491_v5  ;;  %503 = vmatpush.bf16.msra.mxu1 %v491_v5 }
  0x64   : > { %312 = vmatpush.bf16.msra.mxu0 %v490_v6  ;;  %504 = vmatpush.bf16.msra.mxu1 %v490_v6 }
  0x68   : > { %313 = vmatpush.bf16.msra.mxu0 %v489_v9  ;;  %505 = vmatpush.bf16.msra.mxu1 %v489_v9 }
  0x6b   : > { %314 = vmatmul.bf16.vlgmr.msra.gmra.mxu0 %v488_v10  ;;  %319 = vmatmul.bf16.vlgmr.msra.gmra.mxu1 %v255_v11 }
  0xe8   : > { %v315_v13 = vpop.f32.mrf.mxu0  ;;  %v320_v14 = vpop.f32.mrf.mxu1 }
  0xe9   : > { %v316_v15 = vadd.f32 %v565_v12, %v315_v13  ;;  %v321_v16 = vadd.f32 %v565_v12, %v320_v14 }
  0xeb   : > { %324 = vst [vmem:[%s214_s20] sm:$0xff] %v316_v15 }
  0xec   : > { %326 = vst [vmem:[%s214_s20 + $0x10] sm:$0xff] %v321_v16 }
  0xef   : > { %334 = sbr.rel (!%p799_p11) target bundleno = 275 (0x113), region = 44 }
  0xf0   : > { %v317_v17 = vpop.f32.mrf.mxu0  ;;  %v322_v18 = vpop.f32.mrf.mxu1 }
  0xf1   : > { %v318_v19 = vadd.f32 %v565_v12, %v317_v17 }
  0xf3   : > { %325 = vst [vmem:[%s214_s20 + $0x8] sm:$0xff] %v318_v19 }
  0xf4   : > { %s973_s30 = smov (!%p337_p6, %s336_s30), 3 }
  0xf5   : > { %s480_s7 = sshll.u32 %s973_s30, 3 }
  0xf6   : > { %s340_s5 = ssub.s32 24, %s480_s7 }
  0xf7   : > { %s341_s6 = sshll.u32 %s340_s5, 4 }
  0xf8   : > { %342 = vsyncadd %s328_s22, %s341_s6  ;;  %p896_p13 = scmp.ne.s32.totalorder %s480_s7, 0  ;;  %s497_s24 = smul.u32 24, %s768_s16 }
  0xf9   : > { %s347_s19 = sshll.u32 %s214_s20, 4  ;;  %s484_s8 = sshll.u32 %s973_s30, 7  ;;  %s905_s19 = int_to_ptr.vmem [resolvable:$true] %s347_s19 }
  0xfa   : > { %s345_s4 = scalar_lea.hbm %s952_s3, %s497_s24  ;;  %s635_s23 = sshra.s32 %s905_s19, 4  ;;  %s636_s23 = int_to_ptr.vmem [resolvable:$true] %s635_s23 }
  0xfb   : > { %s349_s28 = sshll.u32 %s345_s4, 4  ;;  %s637_s26 = sshrl.u32 %s484_s8, 4  ;;  %s907_s28 = int_to_ptr.hbm [resolvable:$true] %s349_s28 }
  0xfc   : > { %s642_s10 = scalar_lea.vmem %s636_s23, %s637_s26  ;;  %s724_s16 = smov [#allocation7]  }
  0xfd   : > { %p643_p11 = scmp.ne.s32.totalorder %s636_s23, %s642_s10  ;;  %s646_s20 = scalar_lea.vmem %s724_s16, 48 }
  0xfe   : > { %p648_p9 = scmp.lt.s32.totalorder %s646_s20, %s642_s10 }
  0xff   : > { %p644_p2 = pnand %p643_p11, %p896_p13 }
 0x101   : > { %p645_p5 = pneg %p644_p2 }
 0x103   : > { %p650_p10 = pnand %p648_p9, %p645_p5 }
 0x105   : > { %653 = shalt.err (!%p650_p10)
}
 0x106   : > { %s654_s29 = sshra.s32 %s907_s28, 4  ;;  %s665_s24 = scalar_lea.hbm %s952_s3, 40  ;;  %s655_s29 = int_to_ptr.hbm [resolvable:$true] %s654_s29 }
 0x107   : > { %s661_s7 = scalar_lea.hbm %s655_s29, %s637_s26  ;;  %p666_p7 = scmp.lt.s32.totalorder %s655_s29, %s952_s3 }
 0x108   : > { %p662_p1 = scmp.ne.s32.totalorder %s655_s29, %s661_s7  ;;  %p667_p8 = scmp.lt.s32.totalorder %s665_s24, %s661_s7 }
 0x10a   : > { %p663_p0 = pnand %p662_p1, %p896_p13  ;;  %p668_p4 = por %p667_p8, %p666_p7 }
 0x10c   : > { %p664_p3 = pneg %p663_p0 }
 0x10e   : > { %p669_p12 = pnand %p668_p4, %p664_p3 }
 0x110   : > { %672 = shalt.err (!%p669_p12)
}
 0x111   : > { %s725_s4 = smov 128   ;;  %s726_s23 = smov 8  }
 0x112   : > { %355 = dma.vmem_to_hbm [thread:$0]  (%p896_p13), %s905_s19, %s484_s8, %s907_s28, %s328_s22, %s725_s4, %s725_s4, %s726_s23  }
 0x113 PF: > { %s364_s26 = sand.u32 1, %s704_s12   ;;  %p964_p6 = scmp.ne.s32.totalorder %s958_s25, 0 }
 0x114   : > { %p965_p11 = scmp.ge.s32.totalorder %s716_s15, 2  ;;  %s365_s10 = scalar_lea.sflag [#allocation4], %s364_s26 }
 0x116   : > { %p520_p2 = pnand %p965_p11, %p964_p6 }
 0x118   : > { %p521_p5 = pneg %p520_p2 }
 0x11a   : > { %699 = dma.done.wait (%p521_p5), %s365_s10, 384  }
 0x11b   : > { %701 = vsyncadd (%p521_p5), %s365_s10, 4294966912  ;;  %p17_p9 = scmp.ge.s32.totalorder %s772_s18, 4   ;;  %s966_s12 = smov %s708_s13 }
 0x11c   : > { %s967_s13 = smov %s712_s14  ;;  %s968_s14 = smov %s784_s21 }
 0x11d   : > { %s969_s15 = smov %s772_s18  ;;  %19 = sbr.rel (!%p17_p9) target bundleno = 6 (0x6), region = 81 }
 0x122   :  { %371 = vsyncpa [#allocation3], 1 }
 0x123   :  { %373 = vsyncpa [#allocation3 + $0x1], 1 }
 0x124   :  { %374 = vsyncpa [#allocation6], 1 }
 0x125   :  { %375 = vsyncpa [#allocation4], 1 }
 0x126   :  { %377 = vsyncpa [#allocation4 + $0x1], 1 }

</bundles_post_ra>
